<compile_context>
chip_gen: v7x
topology: tpu7x:2x2x1
jax: 0.10.0
libtpu: 0.0.40
codegen_flags: <defaults>
</compile_context>

<pallas_src>
import functools
import math

import jax
import jax.numpy as jnp
from jax.experimental import pallas as pl
from jax.experimental.pallas import tpu as pltpu

LANES = 128  # TPU lane width; all kernel channel axes are padded to this.


def _round_up(x, m):
    return (x + m - 1) // m * m


# ---------------------------------------------------------------------------
# Conv2d (valid padding, stride s) + bias + ReLU.
# ---------------------------------------------------------------------------
def _conv_kernel(x_ref, w_ref, b_ref, o_ref, patch_ref, *, kh, kw, cin, ho_n, wo_n):
    """One batch element per grid step.

    x_ref:     (1, H, W, cin)   bf16  whole (space-to-depth) feature map, VMEM
    w_ref:     (K_pad, 128)     bf16  patch-ordered, zero padded
    b_ref:     (1, 128)         f32
    o_ref:     (1, Ho, Wo, 128) bf16
    patch_ref: (Wo, K_pad)      bf16  VMEM scratch im2col row (never in HBM)
    """
    # Zero once so the K-padding columns stay zero; real columns are rewritten
    # for every output row below.
    patch_ref[...] = jnp.zeros(patch_ref.shape, patch_ref.dtype)

    def row(ho, carry):
        for dh in range(kh):            # kh*kw <= 9 taps: static, unrolled
            for dw in range(kw):
                c0 = (dh * kw + dw) * cin
                patch_ref[:, c0:c0 + cin] = x_ref[0, ho + dh, dw:dw + wo_n, :]
        acc = jnp.dot(patch_ref[...], w_ref[...],
                      preferred_element_type=jnp.float32)      # MXU, f32 acc
        acc = jnp.maximum(acc + b_ref[...], 0.0)               # bias+ReLU (VPU)
        o_ref[0, ho, :, :] = acc.astype(o_ref.dtype)           # lane-dense store
        return carry

    jax.lax.fori_loop(0, ho_n, row, 0)


def _space_to_depth(x, *, kh, kw, stride, ho_n, wo_n, cin_real):
    """Crop to the used window, keep the real channels, and fold the conv
    stride into the channel axis (kh % stride == kw % stride == 0 for this
    module).  A single 1x-size XLA layout pass -- not an im2col blow-up."""
    x = x[:, : (ho_n - 1) * stride + kh, : (wo_n - 1) * stride + kw, :cin_real]
    if stride == 1:
        return x
    b, h, w, c = x.shape
    x = x.reshape(b, h // stride, stride, w // stride, stride, c)
    x = jnp.transpose(x, (0, 1, 3, 2, 4, 5))
    return x.reshape(b, h // stride, w // stride, stride * stride * c)


def conv2d_relu(x_nhwc, w_kxc, b_row, *, kh, kw, stride, cin_real):
    """x_nhwc: (B, H, W, >=cin_real) bf16 -> (B, Ho, Wo, 128) bf16."""
    b, h, w, _ = x_nhwc.shape
    ho_n = (h - kh) // stride + 1
    wo_n = (w - kw) // stride + 1
    xs = _space_to_depth(x_nhwc, kh=kh, kw=kw, stride=stride,
                         ho_n=ho_n, wo_n=wo_n, cin_real=cin_real)
    _, hs, ws, cs = xs.shape
    kh2, kw2 = kh // stride, kw // stride
    k_pad = w_kxc.shape[0]

    kernel = functools.partial(_conv_kernel, kh=kh2, kw=kw2, cin=cs,
                               ho_n=ho_n, wo_n=wo_n)
    return pl.pallas_call(
        kernel,
        out_shape=jax.ShapeDtypeStruct((b, ho_n, wo_n, LANES), jnp.bfloat16),
        grid=(b,),                                  # one batch element / step
        in_specs=[
            pl.BlockSpec((1, hs, ws, cs), lambda i: (i, 0, 0, 0)),
            pl.BlockSpec((k_pad, LANES), lambda i: (0, 0)),
            pl.BlockSpec((1, LANES), lambda i: (0, 0)),
        ],
        out_specs=pl.BlockSpec((1, ho_n, wo_n, LANES), lambda i: (i, 0, 0, 0)),
        scratch_shapes=[pltpu.VMEM((wo_n, k_pad), jnp.bfloat16)],
        compiler_params=pltpu.CompilerParams(
            # v7x: batch grid axis shards across the two TensorCores.
            dimension_semantics=("parallel",)),
    )(xs, w_kxc, b_row)


def _prep_conv_weight(w_pt, b_pt, stride):
    """PyTorch (Cout, Cin, kh, kw) -> (K_pad, 128) bf16 with rows ordered to
    match the kernel's space-to-depth patch layout, plus (1, 128) f32 bias."""
    cout, cin, kh, kw = w_pt.shape
    kh2, kw2 = kh // stride, kw // stride
    k = kh * kw * cin
    k_pad = _round_up(k, LANES)
    w = jnp.transpose(w_pt, (2, 3, 1, 0))                 # (dh, dw, ci, co)
    w = w.reshape(kh2, stride, kw2, stride, cin, cout)    # (qh, rh, qw, rw, ci, co)
    w = jnp.transpose(w, (0, 2, 1, 3, 4, 5))              # (qh, qw, rh, rw, ci, co)
    w = w.reshape(k, cout)
    w = jnp.pad(w, ((0, k_pad - k), (0, LANES - cout))).astype(jnp.bfloat16)
    b = jnp.pad(b_pt, (0, LANES - cout)).reshape(1, LANES).astype(jnp.float32)
    return w, b


# ---------------------------------------------------------------------------
# Fused MLP: fc + ReLU + {mean, log_std, binary} heads + clamp/exp + fwd bias.
# ---------------------------------------------------------------------------
def _mlp_kernel(feat_ref, wfc_ref, bfc_ref,
                w1m_ref, b1m_ref, w2m_ref, b2m_ref,
                w1s_ref, b1s_ref, w2s_ref, b2s_ref,
                w1b_ref, b1b_ref, w2b_ref, b2b_ref,
                fb_ref, mean_ref, std_ref, logit_ref):
    x = feat_ref[...]                                                  # bf16
    h = jnp.dot(x, wfc_ref[...], preferred_element_type=jnp.float32)
    h = jnp.maximum(h + bfc_ref[...], 0.0).astype(jnp.bfloat16)        # (bm, 512)

    def head(w1, b1, w2, b2):
        t = jnp.dot(h, w1[...], preferred_element_type=jnp.float32) + b1[...]
        return jnp.dot(t.astype(jnp.bfloat16), w2[...],
                       preferred_element_type=jnp.float32) + b2[...]

    mean_ref[...] = head(w1m_ref, b1m_ref, w2m_ref, b2m_ref)

    log_std = head(w1s_ref, b1s_ref, w2s_ref, b2s_ref)
    log_std = jnp.clip(log_std, -20.0, 2.0)      # clamp in f32 *before* exp
    std_ref[...] = jnp.exp(log_std)              # EUP transcendental

    logits = head(w1b_ref, b1b_ref, w2b_ref, b2b_ref)
    logit_ref[...] = logits + fb_ref[...]        # forward_bias one-hot row


def mlp_heads(feat, kp):
    b, f = feat.shape
    bm = b                                        # whole (tiny) batch per step

    def tiled(shape):
        return pl.BlockSpec(shape, lambda i: (i,) + (0,) * (len(shape) - 1))

    def whole(arr):
        s = arr.shape
        return pl.BlockSpec(s, lambda i: (0,) * len(s))

    weights = [kp['wfc'], kp['bfc'],
               kp['w1m'], kp['b1m'], kp['w2m'], kp['b2m'],
               kp['w1s'], kp['b1s'], kp['w2s'], kp['b2s'],
               kp['w1b'], kp['b1b'], kp['w2b'], kp['b2b'],
               kp['fb_row']]
    out_shape = tuple(jax.ShapeDtypeStruct((b, LANES), jnp.float32)
                      for _ in range(3))
    return pl.pallas_call(
        _mlp_kernel,
        out_shape=out_shape,
        grid=(pl.cdiv(b, bm),),
        in_specs=[tiled((bm, f))] + [whole(a) for a in weights],
        out_specs=tuple(tiled((bm, LANES)) for _ in range(3)),
        compiler_params=pltpu.CompilerParams(dimension_semantics=("parallel",)),
    )(feat, *weights)


# ---------------------------------------------------------------------------
# Module wrapper (forward pass only).
# ---------------------------------------------------------------------------
class ActorNetVisualize:
    """Pallas/TPU forward pass of the PyTorch ActorNetVisualize module."""

    def __init__(self, max_action, input_shape=(4, 36, 36), action_dim=5, *, key):
        self.max_action = max_action
        self.input_shape = input_shape
        self.action_dim = action_dim
        self.gradients = None        # backward hook -- see TODO in forward()
        self.activations = None

        c_in, h, w = input_shape
        self._convs = [
            dict(kh=8, kw=8, stride=4, cin=c_in, cout=32),
            dict(kh=4, kw=4, stride=2, cin=32, cout=64),
            dict(kh=3, kw=3, stride=1, cin=64, cout=128),
        ]
        for cfg in self._convs:
            assert cfg['kh'] % cfg['stride'] == 0 and cfg['kw'] % cfg['stride'] == 0
            h = (h - cfg['kh']) // cfg['stride'] + 1
            w = (w - cfg['kw']) // cfg['stride'] + 1
        self._h3, self._w3 = h, w
        self.flattened_size = 128 * h * w   # == ActorNet._get_conv_output(...)

        keys = iter(jax.random.split(key, 32))

        def uni(shape, fan_in):
            bound = 1.0 / math.sqrt(fan_in)
            return jax.random.uniform(next(keys), shape, jnp.float32, -bound, bound)

        # PyTorch-layout master parameters (f32); converted once below.
        n_cont = action_dim - 3
        pt = {}
        for i, cfg in enumerate(self._convs):
            fan = cfg['cin'] * cfg['kh'] * cfg['kw']
            pt[f'c{i}_w'] = uni((cfg['cout'], cfg['cin'], cfg['kh'], cfg['kw']), fan)
            pt[f'c{i}_b'] = uni((cfg['cout'],), fan)
        pt['fc_w'] = uni((512, self.flattened_size), self.flattened_size)
        pt['fc_b'] = uni((512,), self.flattened_size)
        for name, n_out in (('mean', n_cont), ('log_std', n_cont), ('binary', 3)):
            pt[f'{name}_w1'] = uni((256, 512), 512)
            pt[f'{name}_b1'] = uni((256,), 512)
            pt[f'{name}_w2'] = uni((n_out, 256), 256)
            pt[f'{name}_b2'] = uni((n_out,), 256)
        pt['forward_bias'] = jnp.float32(10.0)
        self._pt = pt
        self._kp = self._to_kernel_layout(pt)

    def _to_kernel_layout(self, pt):
        kp = {}
        for i, cfg in enumerate(self._convs):
            kp[f'c{i}_w'], kp[f'c{i}_b'] = _prep_conv_weight(
                pt[f'c{i}_w'], pt[f'c{i}_b'], cfg['stride'])
        # fc consumes the lane-dense NHWC flatten; permute its input dim from
        # PyTorch's (C, H, W) flatten order so numerics match the reference.
        wfc = pt['fc_w'].reshape(512, 128, self._h3, self._w3)
        wfc = jnp.transpose(wfc, (0, 2, 3, 1)).reshape(512, self.flattened_size)
        kp['wfc'] = jnp.transpose(wfc).astype(jnp.bfloat16)            # (F, 512)
        kp['bfc'] = pt['fc_b'].reshape(1, 512).astype(jnp.float32)
        for name, tag in (('mean', 'm'), ('log_std', 's'), ('binary', 'b')):
            n_out = pt[f'{name}_w2'].shape[0]
            kp[f'w1{tag}'] = jnp.transpose(pt[f'{name}_w1']).astype(jnp.bfloat16)
            kp[f'b1{tag}'] = pt[f'{name}_b1'].reshape(1, 256).astype(jnp.float32)
            w2 = jnp.pad(jnp.transpose(pt[f'{name}_w2']),
                         ((0, 0), (0, LANES - n_out)))
            kp[f'w2{tag}'] = w2.astype(jnp.bfloat16)                   # (256, 128)
            kp[f'b2{tag}'] = jnp.pad(pt[f'{name}_b2'], (0, LANES - n_out)
                                     ).reshape(1, LANES).astype(jnp.float32)
        # forward_bias as a one-hot lane row, hoisted out of the kernel.
        kp['fb_row'] = jnp.zeros((1, LANES), jnp.float32).at[0, 0].set(
            pt['forward_bias'])
        return kp

    def forward(self, state):
        """state: (B, C, H, W) float32, PyTorch NCHW layout."""
        x = jnp.transpose(state, (0, 2, 3, 1)).astype(jnp.bfloat16)    # NHWC, bf16
        for i, cfg in enumerate(self._convs):
            x = conv2d_relu(x, self._kp[f'c{i}_w'], self._kp[f'c{i}_b'],
                            kh=cfg['kh'], kw=cfg['kw'], stride=cfg['stride'],
                            cin_real=cfg['cin'])
        # x: (B, H3, W3, 128) bf16; conv3's Cout is exactly 128 -> all lanes real.
        bsz = x.shape[0]
        # Grad-CAM activations, kept in PyTorch's (C, H, W) flatten order.
        self.activations = jnp.transpose(x, (0, 3, 1, 2)).reshape(
            bsz, -1).astype(jnp.float32)
        # TODO(synk): activations_hook / self.gradients capture *backward*
        # gradients; producing them needs a custom_vjp around the conv stack,
        # not a forward-pass kernel.

        feat = x.reshape(bsz, -1)               # lane-dense NHWC flatten (free)
        mean_p, std_p, logits_p = mlp_heads(feat, self._kp)
        n_cont = self.action_dim - 3
        return mean_p[:, :n_cont], std_p[:, :n_cont], logits_p[:, :3]

    __call__ = forward


if __name__ == "__main__":
    root = jax.random.PRNGKey(0)
    pkey, xkey = jax.random.split(root)
    batch = 2
    input_shape = (4, 36, 36)   # smallest spatial size the conv stack admits
    net = ActorNetVisualize(max_action=1.0, input_shape=input_shape,
                            action_dim=5, key=pkey)
    state = jax.random.normal(xkey, (batch,) + input_shape, jnp.float32)

    mean, std, binary_logits = net(state)
    jax.block_until_ready((mean, std, binary_logits, net.activations))

    n_cont = net.action_dim - 3
    assert mean.shape == (batch, n_cont)
    assert std.shape == (batch, n_cont)
    assert binary_logits.shape == (batch, 3)
    assert net.activations.shape == (batch, net.flattened_size)
    assert bool(jnp.all(jnp.isfinite(mean)))
    assert bool(jnp.all(std > 0))
    assert bool(jnp.all(jnp.isfinite(binary_logits)))
    print("KERNEL_OK")
</pallas_src>

<mosaic_0001>
module attributes {stable_mosaic.version = 11 : i64} {
  func.func @_conv_kernel(%arg0: i32, %arg1: memref<1x9x9x64xbf16, #tpu.memory_space<vmem>>, %arg2: memref<256x128xbf16, #tpu.memory_space<vmem>>, %arg3: memref<1x128xf32, #tpu.memory_space<vmem>>, %arg4: memref<1x8x8x128xbf16, #tpu.memory_space<vmem>>, %arg5: memref<8x256xbf16, #tpu.memory_space<vmem>>) attributes {dimension_semantics = [#tpu.dimension_semantics<parallel>], iteration_bounds = array<i64: 2>, scalar_prefetch = 0 : i64, scratch_operands = 1 : i64, tpu.core_type = #tpu.core_type<tc>, window_params = [{transform_indices = @transform_0, window_bounds = array<i64: 1, 9, 9, 64>}, {pipeline_mode = #tpu.pipeline_mode<synchronous>, transform_indices = @transform_1, window_bounds = array<i64: 256, 128>}, {pipeline_mode = #tpu.pipeline_mode<synchronous>, transform_indices = @transform_2, window_bounds = array<i64: 1, 128>}, {transform_indices = @transform_3, window_bounds = array<i64: 1, 8, 8, 128>}]} {
    %cst = arith.constant 0.000000e+00 : bf16
    %0 = vector.broadcast %cst : bf16 to vector<8x256xbf16>
    %c0 = arith.constant 0 : index
    %c0_0 = arith.constant 0 : index
    %1 = vector.load %arg5[%c0, %c0_0] : memref<8x256xbf16, #tpu.memory_space<vmem>>, vector<8x256xbf16>
    tpu.vector_store %arg5[%c0, %c0_0], %0 {strides = array<i32>} : memref<8x256xbf16, #tpu.memory_space<vmem>>, vector<8x256xbf16>,
    %c0_i32 = arith.constant 0 : i32
    %c8_i32 = arith.constant 8 : i32
    %2 = arith.addi %c0_i32, %c8_i32 : i32
    %c1_i32 = arith.constant 1 : i32
    scf.for %arg6 = %c0_i32 to %2 step %c1_i32  : i32 {
      %c0_i32_2 = arith.constant 0 : i32
      %3 = arith.addi %arg6, %c0_i32_2 : i32
      %c0_3 = arith.constant 0 : index
      %4 = arith.index_cast %3 : i32 to index
      %c0_4 = arith.constant 0 : index
      %c0_5 = arith.constant 0 : index
      %5 = vector.load %arg1[%c0_3, %4, %c0_4, %c0_5] : memref<1x9x9x64xbf16, #tpu.memory_space<vmem>>, vector<1x1x8x64xbf16>
      %6 = vector.shape_cast %5 : vector<1x1x8x64xbf16> to vector<8x64xbf16>
      %c0_6 = arith.constant 0 : index
      %c0_7 = arith.constant 0 : index
      %7 = vector.load %arg5[%c0_6, %c0_7] : memref<8x256xbf16, #tpu.memory_space<vmem>>, vector<8x64xbf16>
      tpu.vector_store %arg5[%c0_6, %c0_7], %6 {strides = array<i32>} : memref<8x256xbf16, #tpu.memory_space<vmem>>, vector<8x64xbf16>,
      %c0_i32_8 = arith.constant 0 : i32
      %8 = arith.addi %arg6, %c0_i32_8 : i32
      %c0_9 = arith.constant 0 : index
      %9 = arith.index_cast %8 : i32 to index
      %c1 = arith.constant 1 : index
      %c0_10 = arith.constant 0 : index
      %10 = vector.load %arg1[%c0_9, %9, %c1, %c0_10] : memref<1x9x9x64xbf16, #tpu.memory_space<vmem>>, vector<1x1x8x64xbf16>
      %11 = vector.shape_cast %10 : vector<1x1x8x64xbf16> to vector<8x64xbf16>
      %c0_11 = arith.constant 0 : index
      %c64 = arith.constant 64 : index
      %12 = vector.load %arg5[%c0_11, %c64] : memref<8x256xbf16, #tpu.memory_space<vmem>>, vector<8x64xbf16>
      tpu.vector_store %arg5[%c0_11, %c64], %11 {strides = array<i32>} : memref<8x256xbf16, #tpu.memory_space<vmem>>, vector<8x64xbf16>,
      %c1_i32_12 = arith.constant 1 : i32
      %13 = arith.addi %arg6, %c1_i32_12 : i32
      %c0_13 = arith.constant 0 : index
      %14 = arith.index_cast %13 : i32 to index
      %c0_14 = arith.constant 0 : index
      %c0_15 = arith.constant 0 : index
      %15 = vector.load %arg1[%c0_13, %14, %c0_14, %c0_15] : memref<1x9x9x64xbf16, #tpu.memory_space<vmem>>, vector<1x1x8x64xbf16>
      %16 = vector.shape_cast %15 : vector<1x1x8x64xbf16> to vector<8x64xbf16>
      %c0_16 = arith.constant 0 : index
      %c128 = arith.constant 128 : index
      %17 = vector.load %arg5[%c0_16, %c128] : memref<8x256xbf16, #tpu.memory_space<vmem>>, vector<8x64xbf16>
      tpu.vector_store %arg5[%c0_16, %c128], %16 {strides = array<i32>} : memref<8x256xbf16, #tpu.memory_space<vmem>>, vector<8x64xbf16>,
      %c1_i32_17 = arith.constant 1 : i32
      %18 = arith.addi %arg6, %c1_i32_17 : i32
      %c0_18 = arith.constant 0 : index
      %19 = arith.index_cast %18 : i32 to index
      %c1_19 = arith.constant 1 : index
      %c0_20 = arith.constant 0 : index
      %20 = vector.load %arg1[%c0_18, %19, %c1_19, %c0_20] : memref<1x9x9x64xbf16, #tpu.memory_space<vmem>>, vector<1x1x8x64xbf16>
      %21 = vector.shape_cast %20 : vector<1x1x8x64xbf16> to vector<8x64xbf16>
      %c0_21 = arith.constant 0 : index
      %c192 = arith.constant 192 : index
      %22 = vector.load %arg5[%c0_21, %c192] : memref<8x256xbf16, #tpu.memory_space<vmem>>, vector<8x64xbf16>
      tpu.vector_store %arg5[%c0_21, %c192], %21 {strides = array<i32>} : memref<8x256xbf16, #tpu.memory_space<vmem>>, vector<8x64xbf16>,
      %c0_22 = arith.constant 0 : index
      %c0_23 = arith.constant 0 : index
      %23 = vector.load %arg5[%c0_22, %c0_23] : memref<8x256xbf16, #tpu.memory_space<vmem>>, vector<8x256xbf16>
      %c0_24 = arith.constant 0 : index
      %c0_25 = arith.constant 0 : index
      %24 = vector.load %arg2[%c0_24, %c0_25] : memref<256x128xbf16, #tpu.memory_space<vmem>>, vector<256x128xbf16>
      %cst_26 = arith.constant dense<0.000000e+00> : vector<8x128xf32>
      %25 = tpu.matmul %23, %24, %cst_26 {dimension_numbers = #tpu.dot_dimension_numbers<[1], [0], [0], [1], [0, 0, 1, 1], [], []>} : vector<8x256xbf16>, vector<256x128xbf16>, vector<8x128xf32> -> vector<8x128xf32>
      %c0_27 = arith.constant 0 : index
      %c0_28 = arith.constant 0 : index
      %26 = vector.load %arg3[%c0_27, %c0_28] : memref<1x128xf32, #tpu.memory_space<vmem>>, vector<1x128xf32>
      %27 = vector.broadcast %26 : vector<1x128xf32> to vector<8x128xf32>
      %28 = arith.addf %25, %27 : vector<8x128xf32>
      %cst_29 = arith.constant 0.000000e+00 : f32
      %29 = vector.broadcast %cst_29 : f32 to vector<8x128xf32>
      %30 = arith.maximumf %28, %29 : vector<8x128xf32>
      %31 = arith.truncf %30 : vector<8x128xf32> to vector<8x128xbf16>
      %c0_30 = arith.constant 0 : index
      %32 = arith.index_cast %arg6 : i32 to index
      %c0_31 = arith.constant 0 : index
      %c0_32 = arith.constant 0 : index
      %33 = vector.load %arg4[%c0_30, %32, %c0_31, %c0_32] : memref<1x8x8x128xbf16, #tpu.memory_space<vmem>>, vector<1x1x8x128xbf16>
      %34 = vector.shape_cast %33 : vector<1x1x8x128xbf16> to vector<8x128xbf16>
      %35 = vector.shape_cast %31 : vector<8x128xbf16> to vector<1x1x8x128xbf16>
      tpu.vector_store %arg4[%c0_30, %32, %c0_31, %c0_32], %35 {strides = array<i32>} : memref<1x8x8x128xbf16, #tpu.memory_space<vmem>>, vector<1x1x8x128xbf16>,
    }
    %c8_i32_1 = arith.constant 8 : i32
    return
  }
  func.func @transform_0(%arg0: i32) -> (i32, i32, i32, i32) {
    %c0_i32 = arith.constant 0 : i32
    %c0_i32_0 = arith.constant 0 : i32
    %c0_i32_1 = arith.constant 0 : i32
    %c0_i32_2 = arith.constant 0 : i32
    return %arg0, %c0_i32, %c0_i32_0, %c0_i32_1 : i32, i32, i32, i32
  }
  func.func @transform_1(%arg0: i32) -> (i32, i32) {
    %c0_i32 = arith.constant 0 : i32
    %c0_i32_0 = arith.constant 0 : i32
    %c0_i32_1 = arith.constant 0 : i32
    return %c0_i32, %c0_i32_0 : i32, i32
  }
  func.func @transform_2(%arg0: i32) -> (i32, i32) {
    %c0_i32 = arith.constant 0 : i32
    %c0_i32_0 = arith.constant 0 : i32
    %c0_i32_1 = arith.constant 0 : i32
    return %c0_i32, %c0_i32_0 : i32, i32
  }
  func.func @transform_3(%arg0: i32) -> (i32, i32, i32, i32) {
    %c0_i32 = arith.constant 0 : i32
    %c0_i32_0 = arith.constant 0 : i32
    %c0_i32_1 = arith.constant 0 : i32
    %c0_i32_2 = arith.constant 0 : i32
    return %arg0, %c0_i32, %c0_i32_0, %c0_i32_1 : i32, i32, i32, i32
  }
}

</mosaic_0001>

<bundles_post_ra>
// kernel: tpu_custom_call.1
= control target key start
LH: loop header
LB: loop body
LE: loop exit
PB: predicated region body
PF: predicated region fallthrough
CT: control target
= control target key end

     0   :  { %8 = vsyncpa [#allocation4], 0  ;;  %s933_s0 = inlined_call_operand.vmem [shape: bf16[2,9,9,64], index: 0, kind: input, shape index: {}]   ;;  %s934_s1 = inlined_call_operand.vmem [shape: bf16[256,128], index: 1, kind: input, shape index: {}]   ;;  %s935_s2 = inlined_call_operand.vmem [shape: f32[1,128], index: 2, kind: input, shape index: {}]   ;;  %s936_s3 = inlined_call_operand.hbm [shape: bf16[2,8,8,128], index: 3, kind: output, shape index: {}]  }
   0x1   :  { %10 = vsyncpa [#allocation4 + $0x1], 0  ;;  %s737_s12 = smov 0   ;;  %s739_s13 = smov 0  }
   0x2   :  { %s741_s14 = smov 0   ;;  %s743_s15 = smov 0  }
   0x3 LB: > { %s758_s16 = sadd.s32 4294967295, %s706_s15   ;;  %s509_s17 = sadd.s32 4294967294, %s706_s15   ;;  %s706_s15 = sphi %s743_s15, %s944_s15   ;;  %s702_s14 = sphi %s741_s14, %s943_s14   ;;  %s698_s13 = sphi %s739_s13, %s942_s13   ;;  %s694_s12 = sphi %s737_s12, %s941_s12  }
   0x4   : > { %s762_s18 = sadd.s32 1, %s706_s15   ;;  %s91_s19 = sadd.s32 1, %s702_s14 }
   0x5   : > { %s88_s20 = ssub.s32 %s706_s15, %s762_s18  ;;  %p101_p0 = scmp.ne.s32.totalorder %s702_s14, %s698_s13 }
   0x6   : > { %p89_p1 = scmp.eq.s32.totalorder %s88_s20, 0  ;;  %p102_p2 = scmp.eq.s32.totalorder %s758_s16, 1 }
   0x7   : > { %p107_p3 = scmp.ne.s32.totalorder %s698_s13, %s694_s12  ;;  %p108_p4 = scmp.eq.s32.totalorder %s509_s17, 1 }
   0x8   : > { %s773_s21 = scalar_select %p89_p1, %s702_s14, %s91_s19  }
   0x9   : > { %p775_p5 = por %p102_p2, %p101_p0  ;;  %p779_p6 = por %p108_p4, %p107_p3 }
   0xa   : > { %p512_p7 = scmp.ge.s32.totalorder %s706_s15, 1  ;;  %p140_p8 = scmp.lt.s32.totalorder %s706_s15, 3 }
   0xc   : > { %p141_p9 = pnand %p512_p7, %p140_p8 }
   0xd   : > { %s161_s24 = sand.u32 (!%p141_p9), 1, %s698_s13   ;;  %p164_p10 = scmp.lt.s32.totalorder (!%p141_p9), %s758_s16, 1  ;;  %v712_v0 = vmov (!%p141_p9), 0  }
   0xe   : > { %144 = sbr.rel (%p141_p9) target bundleno = 404 (0x194), region = 32  ;;  %s789_s25 = sshll.u32 (!%p141_p9), %s161_s24, 5  ;;  %170 = vst [vmem:[#allocation2] sm:$0xff] (!%p141_p9), %v712_v0 }
   0xf   : > { %s163_s4 = scalar_lea.vmem (!%p141_p9), [#allocation3], %s789_s25  ;;  %s798_s5 = smov (!%p141_p9), 0  }
  0x15   : > { %s165_s26 = scalar_select %p164_p10, %s758_s16, 1 }
  0x17   : > { %s570_s27 = smul.u32 72, %s165_s26 }
  0x19   : > { %s795_s30 = scalar_lea.vmem %s933_s0, %s570_s27 }
  0x1a LB: >> { %vm185_vm0 = vsmask.f32 3328  ;;  %v622_v1 = vld [vmem:[%s934_s1 + $0x40] sm:$0xff]   ;;  %vm186_vm1 = vsmask.f32 7440  ;;  %s546_s8 = sshll.u32 %s710_s5, 3  ;;  %s710_s5 = sphi %s798_s5, %s176_s5  }
  0x1b   : >> { %548 = vmatprep.subr.bf16.mxu0 %v622_v1  ;;  %v623_v2 = vld [vmem:[%s934_s1] sm:$0xff]   ;;  %s811_s11 = scalar_lea.vmem %s795_s30, %s546_s8  ;;  %v624_v3 = vld [vmem:[%s934_s1 + $0x48] sm:$0xff]   ;;  %v626_v18 = vld [vmem:[%s934_s1 + $0x50] sm:$0xff]   ;;  %vm181_vm3 = vcmask 519168   ;;  %s713_s17 = smov 64   ;;  %vm205_vm4 = vcmask 1043968  }
  0x1c   : >> { %v183_v4 = vld [vmem:[%s811_s11] sm:$0xf]  ;;  %v184_v5 = vld [vmem:[%s811_s11 + $0x4] sm:$0x1]  ;;  %v519_v6 = vld [vmem:[%s811_s11 + $0x8] sm:$0xf]  ;;  %549 = vmatpush3.bf16.msra.mxu0 %v623_v2 }
  0x1d   : >> { %v189_v7 = vshrl.u32 %v183_v4, 16  ;;  %v192_v8 = vshll.u32 %v183_v4, 16  ;;  %v198_v9 = vshll.u32 %v184_v5, 16  ;;  %v520_v10 = vld [vmem:[%s811_s11 + $0xc] sm:$0x1]  ;;  %v216_v11 = vshrl.u32 %v519_v6, 16  ;;  %550 = vmatprep.subr.bf16.mxu0 %v624_v3  ;;  %vm828_vm2 = vmor %vm185_vm0, %vm186_vm1 }
  0x1e   : >> { %v219_v12 = vshll.u32 %v519_v6, 16  ;;  %v225_v16 = vshll.u32 %v520_v10, 16  ;;  %v625_v17 = vld [vmem:[%s934_s1 + $0x8] sm:$0xff]   ;;  %v627_v23 = vld [vmem:[%s934_s1 + $0x10] sm:$0xff]   ;;  %v628_v25 = vld [vmem:[%s934_s1 + $0x58] sm:$0xff]   ;;  %s540_s29 = sshll.u32 %s710_s5, 2 }
  0x1f   : >> { %v191_v13 = vrot.slane %v189_v7, 4  ;;  %v194_v14 = vrot.slane %v192_v8, 5  ;;  %v218_v15 = vrot.slane %v216_v11, 4  ;;  %v200_v22 = vrot.slane %v198_v9, 5  ;;  %v629_v29 = vld [vmem:[%s934_s1 + $0x18] sm:$0xff]   ;;  %v630_v32 = vld [vmem:[%s934_s1 + $0x60] sm:$0xff]   ;;  %s419_s6 = scalar_lea.vmem %s163_s4, %s540_s29 [#allocation3] }
  0x20   : >> { %v221_v20 = vrot.slane %v219_v12, 5  ;;  %551 = vmatpush3.bf16.msra.mxu0 %v625_v17  ;;  %v227_v27 = vrot.slane %v225_v16, 5  ;;  %v180_v31 = vld [vmem:[%s811_s11] sm:$0xf]  ;;  %v518_v34 = vld [vmem:[%s811_s11 + $0x8] sm:$0xf] }
  0x21   : >> { %v195_v21 = vor.u32 %v194_v14, %v191_v13  ;;  %552 = vmatprep.subr.bf16.mxu0 %v626_v18  ;;  %182 = vst.msk [vmem:[#allocation2] sm:$0xf] %vm181_vm3, %v180_v31  ;;  %212 = vst.msk [vmem:[#allocation2 + $0x4] sm:$0xf] %vm181_vm3, %v518_v34  ;;  %v631_v35 = vld [vmem:[%s934_s1 + $0x20] sm:$0xff]   ;;  %v632_v36 = vld [vmem:[%s934_s1 + $0x68] sm:$0xff]  }
  0x22   : >> { %v222_v24 = vor.u32 %v221_v20, %v218_v15  ;;  %v633_v37 = vld [vmem:[%s934_s1 + $0x28] sm:$0xff]   ;;  %v634_v38 = vld [vmem:[%s934_s1 + $0x70] sm:$0xff]   ;;  %v636_v40 = vld [vmem:[%s934_s1 + $0x78] sm:$0xff]   ;;  %s176_s5 = sadd.s32 1, %s710_s5  }
  0x23   : >> { %v196_v26 = vrot.slane %v195_v21, 4  ;;  %v635_v39 = vld [vmem:[%s934_s1 + $0x30] sm:$0xff]   ;;  %v637_v41 = vld [vmem:[%s934_s1 + $0x38] sm:$0xff]   ;;  %v521_v48 = vld [vmem:[%s935_s2] ss:$0 sm:$0xff]  ;;  %p173_p11 = scmp.ge.s32.totalorder %s176_s5, 8  }
  0x24   : >> { %v223_v28 = vrot.slane %v222_v24, 4  ;;  %553 = vmatpush3.bf16.msra.mxu0 %v627_v23  ;;  %s547_s7 = sshll.u32 (%p173_p11), %s758_s16, 9  ;;  %s435_s10 = sshll.u32 (%p173_p11), %s163_s4, 4  ;;  %s888_s10 = int_to_ptr.vmem [resolvable:$true] %s435_s10 }
  0x25   : >> { %v201_v30 = vsel %vm828_vm2, %v196_v26, %v200_v22  ;;  %554 = vmatprep.subr.bf16.mxu0 %v628_v25  ;;  %s884_s9 = scalar_lea.hbm (%p173_p11), %s936_s3, %s547_s7  ;;  %s892_s5 = scalar_lea.sflag (%p173_p11), [#allocation4], %s161_s24 }
  0x26   : >> { %202 = vrot.lane.b32.xlu0 %v201_v30, %s713_s17  ;;  %v228_v33 = vsel %vm828_vm2, %v223_v28, %v227_v27  ;;  %s640_s30 = scalar_lea.vmem (%p173_p11), %s888_s10, 512  ;;  %s714_s16 = smov (%p173_p11), [#allocation3]  }
  0x27   : > { %p641_p12 = scmp.ne.s32.totalorder (%p173_p11), %s888_s10, %s640_s30 }
  0x28   : >> { %555 = vmatpush3.bf16.msra.mxu0 %v629_v29 }
  0x29   : >> { %556 = vmatprep.subr.bf16.mxu0 %v630_v32  ;;  %p642_p13 = pnand (%p173_p11), %p641_p12, %p775_p5 }
  0x2a   : >> { %229 = vrot.lane.b32.xlu0 %v228_v33, %s713_s17  ;;  %s644_s17 = sshll.u32 (%p173_p11), %s714_s16, 4  ;;  %s645_s17 = int_to_ptr.vmem [resolvable:$false] %s644_s17 }
  0x2b   : > { %p643_p0 = pneg (%p173_p11), %p642_p13  ;;  %s646_s19 = scalar_lea.vmem (%p173_p11), %s645_s17, 1024 }
  0x2c   : >> { %557 = vmatpush3.bf16.msra.mxu0 %v631_v35  ;;  %p647_p1 = scmp.lt.s32.totalorder (%p173_p11), %s888_s10, %s645_s17  ;;  %p648_p2 = scmp.lt.s32.totalorder (%p173_p11), %s646_s19, %s640_s30 }
  0x2d   : >> { %558 = vmatprep.subr.bf16.mxu0 %v632_v36 }
  0x2e   : > { %p649_p3 = por (%p173_p11), %p648_p2, %p647_p1 }
  0x30   : >> { %559 = vmatpush3.bf16.msra.mxu0 %v633_v37  ;;  %p650_p4 = pnand (%p173_p11), %p649_p3, %p643_p0 }
  0x31   : >> { %560 = vmatprep.subr.bf16.mxu0 %v634_v38 }
  0x34   : >> { %561 = vmatpush3.bf16.msra.mxu0 %v635_v39 }
  0x35   : >> { %562 = vmatprep.subr.bf16.mxu0 %v636_v40 }
  0x38   : >> { %563 = vmatpush3.bf16.msra.mxu0 %v637_v41 }
  0x98   : >> { %v203_v42 = vpop.permute.xlu0 %202 }
  0x99   : >> { %206 = vst.msk [vmem:[#allocation2] sm:$0xf] %vm205_vm4, %v203_v42 }
  0x9c   : >> { %v230_v43 = vpop.permute.xlu0 %229 }
  0x9d   : >> { %232 = vst.msk [vmem:[#allocation2 + $0x4] sm:$0xf] %vm205_vm4, %v230_v43 }
  0xa4   : >> { %v233_v44 = vld [vmem:[#allocation2] sm:$0xff] }
  0xa5   : >> { %v522_v45 = vcombine.low %v233_v44, %v233_v44  ;;  %v523_v46 = vcombine.high %v233_v44, %v233_v44 }
  0xa7   : >> { %408 = vmatprep.mubr.bf16.mxu0 %v523_v46 }
  0xa8   : >> { %409 = vmatmul.mubr.bf16.vlgmr.msra.gmra.mrb[0].mxu0 %v522_v45 }
 0x17b   : >> { %v564_v47 = vpop.f32.mrb[0].mxu0 }
 0x17c   : >> { %v565_v49 = vpop.f32.mrb[1].mxu0 }
 0x17d   : >> { %v566_v50 = vadd.f32 %v565_v49, %v564_v47  ;;  %v567_v51 = vpop.f32.mrb[2].mxu0 }
 0x17e   : >> { %v568_v52 = vpop.f32.mrb[3].mxu0 }
 0x17f   : >> { %v411_v53 = vadd.f32 %v566_v50, %v521_v48  ;;  %175 = sbr.rel (!%p173_p11) target bundleno = 26 (0x1a), region = 77 }
 0x181   : >> { %v416_v54 = vmax.f32 %v411_v53, 0.0 }
 0x183   : >> { %v417_v55 = vpack.c.bf16 %v416_v54, %v416_v54 }
 0x185   : >> { %420 = vst [vmem:[%s419_s6] sm:$0xf] %v417_v55 }
 0x186   : > { %653 = shalt.err (!%p650_p4)
}
 0x187   : > { %s654_s24 = scalar_lea.hbm %s884_s9, 512  ;;  %s658_s20 = scalar_lea.hbm %s936_s3, 1024 }
 0x188   : > { %p655_p7 = scmp.ne.s32.totalorder %s884_s9, %s654_s24  ;;  %p659_p10 = scmp.lt.u32.totalorder %s884_s9, %s936_s3 }
 0x189   : > { %p660_p11 = scmp.lt.u32.totalorder %s658_s20, %s654_s24  ;;  %p662_p13 = scmp.lt.u32.totalorder %s654_s24, %s884_s9 }
 0x18a   : > { %p656_p8 = pnand %p655_p7, %p775_p5 }
 0x18b   : > { %p661_p12 = por %p660_p11, %p659_p10 }
 0x18c   : > { %p657_p9 = pneg %p656_p8 }
 0x18d   : > { %p663_p0 = por %p662_p13, %p661_p12 }
 0x18f   : > { %p664_p1 = pnand %p663_p0, %p657_p9 }
 0x191   : > { %667 = shalt.err (!%p664_p1)
}
 0x192   : > { %s715_s28 = smov 64   ;;  %s716_s29 = smov 4  }
 0x193   : > { %571 = dma.vmem_to_hbm [thread:$0]  (%p775_p5), %s888_s10, 512, %s884_s9, %s892_s5, %s715_s28, %s715_s28, %s716_s29  }
 0x194 PF: > { %p577_p2 = scmp.ge.s32.totalorder %s706_s15, 2  ;;  %s450_s6 = sand.u32 1, %s694_s12  }
 0x195   : > { %s451_s7 = scalar_lea.sflag [#allocation4], %s450_s6 }
 0x196   : > { %p574_p3 = pnand %p577_p2, %p779_p6 }
 0x198   : > { %689 = dma.done.wait (!%p574_p3), %s451_s7, 512  }
 0x199   : > { %691 = vsyncadd (!%p574_p3), %s451_s7, 4294966784  ;;  %p13_p4 = scmp.ge.s32.totalorder %s762_s18, 4   ;;  %s941_s12 = smov %s698_s13 }
 0x19a   : > { %s942_s13 = smov %s702_s14  ;;  %s943_s14 = smov %s773_s21 }
 0x19b   : > { %s944_s15 = smov %s762_s18  ;;  %15 = sbr.rel (!%p13_p4) target bundleno = 3 (0x3), region = 88 }
 0x1a2   :  { %456 = vsyncpa [#allocation4], 1 }
 0x1a3   :  { %458 = vsyncpa [#allocation4 + $0x1], 1 }

</bundles_post_ra>
